<compile_context>
chip_gen: v7x
topology: tpu7x:2x2x1
jax: 0.10.0
libtpu: 0.0.40
codegen_flags: <defaults>
</compile_context>

<pallas_src>
import functools

import jax
import jax.numpy as jnp
from jax import lax
from jax.experimental import pallas as pl
from jax.experimental.pallas import tpu as pltpu


# Explicit VMEM budgets (chosen to be safe on v5e/v6e/v7x).
_VMEM_LIMIT_BYTES = 32 * 1024 * 1024      # > v5e's 16 MiB default, < v7x physical
_VMEM_INPUT_BUDGET = 14 * 1024 * 1024     # double-buffered feats block budget


def _pick_c_tile(C, HW, budget=_VMEM_INPUT_BUDGET):
    """Largest 128-multiple channel tile dividing C whose double-buffered
    (HW, ct) f32 block fits the budget; falls back to 128-wide tiles, then to
    the full channel dim for small / non-128-divisible models."""
    fitting = [ct for ct in (1024, 512, 256, 128) if C % ct == 0]
    for ct in fitting:
        if 2 * HW * ct * 4 <= budget:
            return ct
    if fitting:
        return fitting[-1]
    # TODO(synk): for a large C not divisible by 128, pad C (zero weights)
    # instead of loading the full channel dim in one block.
    return C


# ----------------------------------------------------------------------------
# Pallas kernel 1: per-tap projections of the 3x3 conv head (cin -> 1, bias=False).
#
# grid = (N, C // ct).  Per step: one MXU matmul (HW, ct) @ (ct, 9) of the
# native-layout feats channel tile against the tap-minor weights, accumulated
# over channel tiles into the VMEM-resident (1, HW, 9) output block.
# The tiny 3x3 stencil combine of the 9 tap maps is done in XLA together with
# the BN batch-stats reduction (see disentangler_pallas).
# ----------------------------------------------------------------------------
def _tap_matmul_kernel(w_ref, x_ref, tap_ref):
    # w_ref  : (ct, 9)      channel tile of head weights, tap-minor (tap = 3*kh + kw)
    # x_ref  : (1, HW, ct)  native-layout feats channel tile, one sample
    # tap_ref: (1, HW, 9)   per-tap responses, accumulated over channel tiles
    @pl.when(pl.program_id(1) == 0)
    def _():
        tap_ref[...] = jnp.zeros_like(tap_ref)

    contrib = jnp.dot(x_ref[0], w_ref[...],
                      preferred_element_type=jnp.float32)            # (HW, 9)
    tap_ref[...] += contrib.reshape(tap_ref.shape)


# ----------------------------------------------------------------------------
# Pallas kernel 2: BatchNorm2d(1) normalize (precomputed batch stats) + sigmoid
# + ccam-weighted pooling, channel-tiled.  grid = (N, C // ct).
# ccam / [ccam; 1-ccam] are computed once per sample (c == 0) and reused across
# channel tiles; fg/bg come from one fused (2, HW) @ (HW, ct) matmul per tile.
# ----------------------------------------------------------------------------
def _bn_sig_pool_kernel(stats_ref, conv_ref, x_ref, fgbg_ref, ccam_ref, lhs_ref,
                        *, apply_sigmoid, inv_hw):
    # stats_ref: (4,) SMEM   [gamma, beta, mean, inv_std]
    # conv_ref : (1, 1, HW)  raw conv response row for this sample
    # x_ref    : (1, HW, ct) native-layout feats channel tile
    # fgbg_ref : (1, 2, ct)  row 0 = fg_feats, row 1 = bg_feats (this tile)
    # ccam_ref : (1, 1, HW)  resident across channel tiles
    # lhs_ref  : (2, HW) f32 VMEM scratch: [ccam ; 1 - ccam]
    @pl.when(pl.program_id(1) == 0)
    def _():
        gamma = stats_ref[0]
        beta = stats_ref[1]
        mean = stats_ref[2]
        inv_std = stats_ref[3]

        act = gamma * (conv_ref[0] - mean) * inv_std + beta           # (1, HW)
        if apply_sigmoid:
            # exp and reciprocal both go to the EUP slot.
            ccam = pl.reciprocal(1.0 + jnp.exp(-act), approx=False)
        else:
            ccam = act                                                # inference=True

        lhs_ref[...] = jnp.concatenate([ccam, 1.0 - ccam], axis=0)    # (2, HW)
        ccam_ref[...] = ccam.reshape(ccam_ref.shape)

    pooled = jnp.dot(lhs_ref[...], x_ref[0],
                     preferred_element_type=jnp.float32) * inv_hw     # (2, ct)
    fgbg_ref[...] = pooled.reshape(fgbg_ref.shape)


# ----------------------------------------------------------------------------
# Disentangler (ac_head) wrapper around the two Pallas kernels.
# ----------------------------------------------------------------------------
def disentangler_pallas(feats, w_head, gamma, beta, inference=False):
    # feats: (N, Hf, Wf, C) float32, w_head: (3, 3, C) float32
    N, Hf, Wf, C = feats.shape
    HW = Hf * Wf

    # Native layout: a pure reshape (no HBM copy).
    x_flat = feats.reshape(N, HW, C)
    # Tap-minor weights (C, 9); tiny tensor, cheap XLA transpose.
    w_c9 = jnp.transpose(w_head.reshape(9, C)).astype(jnp.float32)

    ct1 = _pick_c_tile(C, HW)
    # TODO(synk): if N == 1 at inference on v7x, make the channel-tile axis the
    # parallel axis instead of batch so both TensorCores get work.
    taps = pl.pallas_call(
        _tap_matmul_kernel,
        out_shape=jax.ShapeDtypeStruct((N, HW, 9), jnp.float32),
        grid=(N, C // ct1),
        in_specs=[
            pl.BlockSpec((ct1, 9), lambda n, c: (c, 0)),
            pl.BlockSpec((1, HW, ct1), lambda n, c: (n, 0, c)),
        ],
        out_specs=pl.BlockSpec((1, HW, 9), lambda n, c: (n, 0, 0)),
        compiler_params=pltpu.CompilerParams(
            dimension_semantics=("parallel", "arbitrary"),
            vmem_limit_bytes=_VMEM_LIMIT_BYTES),
    )(w_c9, x_flat)

    # Tiny XLA epilogue on the (N, HW, 9) tap map (<1% of feats bytes):
    # 3x3 stencil combine (== the padding=1 conv) fused with the BatchNorm
    # batch-statistics reduction that has to leave the kernel anyway.
    tap_img = taps.reshape(N, Hf, Wf, 9)
    tap_pad = jnp.pad(tap_img, ((0, 0), (1, 1), (1, 1), (0, 0)))
    conv = jnp.zeros((N, Hf, Wf), jnp.float32)
    for kh in range(3):
        for kw in range(3):
            conv = conv + tap_pad[:, kh:kh + Hf, kw:kw + Wf, 3 * kh + kw]

    conv_flat = conv.reshape(N, HW)
    mean = jnp.mean(conv_flat)
    var = jnp.mean((conv_flat - mean) ** 2)                 # biased (training BN)
    inv_std = lax.rsqrt(var + 1e-5)
    # NOTE: matches the reference (training-mode batch stats even for
    # inference=True), same as the original in-file semantics.
    stats = jnp.stack([
        jnp.asarray(gamma, jnp.float32),
        jnp.asarray(beta, jnp.float32),
        mean.astype(jnp.float32),
        inv_std.astype(jnp.float32),
    ])

    conv_row = conv_flat.reshape(N, 1, HW)   # pure reshape, contiguous

    ct2 = _pick_c_tile(C, HW)
    kern = functools.partial(_bn_sig_pool_kernel,
                             apply_sigmoid=not inference,
                             inv_hw=1.0 / float(HW))
    fgbg, ccam = pl.pallas_call(
        kern,
        out_shape=(
            jax.ShapeDtypeStruct((N, 2, C), jnp.float32),
            jax.ShapeDtypeStruct((N, 1, HW), jnp.float32),
        ),
        grid=(N, C // ct2),
        in_specs=[
            pl.BlockSpec(memory_space=pltpu.MemorySpace.SMEM),
            pl.BlockSpec((1, 1, HW), lambda n, c: (n, 0, 0)),
            pl.BlockSpec((1, HW, ct2), lambda n, c: (n, 0, c)),
        ],
        out_specs=(
            pl.BlockSpec((1, 2, ct2), lambda n, c: (n, 0, c)),
            pl.BlockSpec((1, 1, HW), lambda n, c: (n, 0, 0)),
        ),
        scratch_shapes=[pltpu.VMEM((2, HW), jnp.float32)],
        compiler_params=pltpu.CompilerParams(
            dimension_semantics=("parallel", "arbitrary"),
            vmem_limit_bytes=_VMEM_LIMIT_BYTES),
    )(stats, conv_row, x_flat)

    fg = fgbg[:, 0, :]
    bg = fgbg[:, 1, :]
    return fg, bg, ccam.reshape(N, 1, Hf, Wf)


# ----------------------------------------------------------------------------
# Encoder glue (plain JAX).
# TODO(synk): ResNet50 with mocov2 pretrained checkpoint has no in-script
# equivalent (no .pth loading); it is stubbed with a small deterministic conv
# stack that reproduces the multi-scale structure (x1..x5, cat([x5, x4])).
# ----------------------------------------------------------------------------
def _conv2d(x, w, stride, padding):
    return lax.conv_general_dilated(
        x, w, (stride, stride), padding,
        dimension_numbers=("NHWC", "HWIO", "NHWC"))


def _maxpool3x3s2(x):
    return lax.reduce_window(
        x, -jnp.inf, lax.max,
        window_dimensions=(1, 3, 3, 1),
        window_strides=(1, 2, 2, 1),
        padding=((0, 0), (1, 1), (1, 1), (0, 0)))


def encoder_forward(x, p):
    # x: (N, H, W, 3) NHWC
    x0 = _conv2d(x, p["conv1"], 2, [(3, 3), (3, 3)])       # conv1 7x7/2
    x1 = jax.nn.relu(x0)                                    # bn1 (fresh BN) + relu
    xp = _maxpool3x3s2(x1)                                  # maxpool 3x3/2
    x2 = jax.nn.relu(_conv2d(xp, p["l1"], 1, [(1, 1), (1, 1)]))
    x3 = jax.nn.relu(_conv2d(x2, p["l2"], 2, [(1, 1), (1, 1)]))
    x4 = jax.nn.relu(_conv2d(x3, p["l3"], 2, [(1, 1), (1, 1)]))
    x5 = jax.nn.relu(_conv2d(x4, p["l4"], 1, [(1, 1), (1, 1)]))  # same spatial as x4
    feats = jnp.concatenate([x5, x4], axis=-1)              # torch.cat([x5, x4], dim=1)
    return feats, [x1, x2, x3, x4, x5]


# ----------------------------------------------------------------------------
# USOD forward.
# ----------------------------------------------------------------------------
def usod_forward(x_nchw, params, cam_only=False):
    x = jnp.transpose(x_nchw, (0, 2, 3, 1)).astype(jnp.float32)   # NCHW -> NHWC
    feats, _skips = encoder_forward(x, params)
    fg, bg, ccam = disentangler_pallas(
        feats, params["head_w"], params["bn_gamma"], params["bn_beta"],
        inference=cam_only)
    if cam_only:
        return ccam
    # TODO(synk): cornet_decoder definition is not provided in the reference
    # module; the decoder path (x = self.decoder(x, x_size)) is omitted.
    return fg, bg, ccam


# ----------------------------------------------------------------------------
# Pure-JAX reference for the Disentangler (for correctness checking).
# ----------------------------------------------------------------------------
def disentangler_reference(feats, w_head, gamma, beta, inference=False):
    N, Hf, Wf, C = feats.shape
    conv = lax.conv_general_dilated(
        feats, w_head[..., None], (1, 1), [(1, 1), (1, 1)],
        dimension_numbers=("NHWC", "HWIO", "NHWC"))[..., 0]       # (N, Hf, Wf)
    mean = conv.mean()
    var = ((conv - mean) ** 2).mean()
    act = gamma * (conv - mean) * lax.rsqrt(var + 1e-5) + beta
    ccam = act if inference else 1.0 / (1.0 + jnp.exp(-act))
    ccam_flat = ccam.reshape(N, 1, Hf * Wf)
    xflat = feats.reshape(N, Hf * Wf, C)
    fg = jnp.matmul(ccam_flat, xflat)[:, 0, :] / (Hf * Wf)
    bg = jnp.matmul(1.0 - ccam_flat, xflat)[:, 0, :] / (Hf * Wf)
    return fg, bg, ccam.reshape(N, 1, Hf, Wf)


def init_params(key):
    ks = jax.random.split(key, 6)

    def w(k, shape, fan_in):
        return jax.random.normal(k, shape, jnp.float32) / jnp.sqrt(float(fan_in))

    p = {
        "conv1": w(ks[0], (7, 7, 3, 8), 7 * 7 * 3),
        "l1": w(ks[1], (3, 3, 8, 8), 3 * 3 * 8),
        "l2": w(ks[2], (3, 3, 8, 12), 3 * 3 * 8),
        "l3": w(ks[3], (3, 3, 12, 16), 3 * 3 * 12),   # -> x4 channels (analog of 1024)
        "l4": w(ks[4], (3, 3, 16, 32), 3 * 3 * 16),   # -> x5 channels (analog of 2048)
        # activation_head: Conv2d(cin, 1, 3, padding=1, bias=False), cin = 32 + 16
        "head_w": w(ks[5], (3, 3, 48), 3 * 3 * 48),
        # BatchNorm2d(1) fresh init
        "bn_gamma": jnp.float32(1.0),
        "bn_beta": jnp.float32(0.0),
    }
    return p


if __name__ == "__main__":
    root = jax.random.PRNGKey(0)
    k_params, k_input = jax.random.split(root)
    params = init_params(k_params)

    # Small image consistent with the module (NCHW like PyTorch).
    x = jax.random.normal(k_input, (2, 3, 64, 64), jnp.float32)

    fg, bg, ccam = usod_forward(x, params, cam_only=False)
    jax.block_until_ready((fg, bg, ccam))

    # cam_only=True path (inference=True in the Disentangler: no sigmoid).
    ccam_only = usod_forward(x, params, cam_only=True)
    jax.block_until_ready(ccam_only)

    # Correctness check of the Pallas head against a pure-JAX reference.
    x_nhwc = jnp.transpose(x, (0, 2, 3, 1))
    feats, _ = encoder_forward(x_nhwc, params)
    fg_r, bg_r, ccam_r = disentangler_reference(
        feats, params["head_w"], params["bn_gamma"], params["bn_beta"])
    assert bool(jnp.allclose(fg, fg_r, atol=1e-4, rtol=1e-4))
    assert bool(jnp.allclose(bg, bg_r, atol=1e-4, rtol=1e-4))
    assert bool(jnp.allclose(ccam, ccam_r, atol=1e-4, rtol=1e-4))

    # Inference path check (no sigmoid).
    _, _, ccam_inf_r = disentangler_reference(
        feats, params["head_w"], params["bn_gamma"], params["bn_beta"],
        inference=True)
    assert bool(jnp.allclose(ccam_only, ccam_inf_r, atol=1e-4, rtol=1e-4))

    print("KERNEL_OK")
</pallas_src>

<mosaic_0001>
module attributes {stable_mosaic.version = 11 : i64} {
  func.func @_tap_matmul_kernel(%arg0: i32, %arg1: i32, %arg2: memref<48x9xf32, #tpu.memory_space<vmem>>, %arg3: memref<1x16x48xf32, #tpu.memory_space<vmem>>, %arg4: memref<1x16x9xf32, #tpu.memory_space<vmem>>) attributes {dimension_semantics = [#tpu.dimension_semantics<parallel>, #tpu.dimension_semantics<arbitrary>], iteration_bounds = array<i64: 2, 1>, scalar_prefetch = 0 : i64, scratch_operands = 0 : i64, tpu.core_type = #tpu.core_type<tc>, window_params = [{transform_indices = @transform_0, window_bounds = array<i64: 48, 9>}, {transform_indices = @transform_1, window_bounds = array<i64: 1, 16, 48>}, {transform_indices = @transform_2, window_bounds = array<i64: 1, 16, 9>}]} {
    %c0_i32 = arith.constant 0 : i32
    %0 = arith.cmpi eq, %arg1, %c0_i32 : i32
    %1 = arith.extui %0 : i1 to i32
    %c0_i32_0 = arith.constant 0 : i32
    %2 = arith.cmpi ne, %1, %c0_i32_0 : i32
    scf.if %2 {
      %cst_11 = arith.constant 0.000000e+00 : f32
      %11 = vector.broadcast %cst_11 : f32 to vector<1x16x9xf32>
      %c0_12 = arith.constant 0 : index
      %c0_13 = arith.constant 0 : index
      %c0_14 = arith.constant 0 : index
      %12 = vector.load %arg4[%c0_12, %c0_13, %c0_14] : memref<1x16x9xf32, #tpu.memory_space<vmem>>, vector<1x16x9xf32>
      tpu.vector_store %arg4[%c0_12, %c0_13, %c0_14], %11 {strides = array<i32>} : memref<1x16x9xf32, #tpu.memory_space<vmem>>, vector<1x16x9xf32>,
    } else {
    }
    %c0 = arith.constant 0 : index
    %c0_1 = arith.constant 0 : index
    %c0_2 = arith.constant 0 : index
    %3 = vector.load %arg3[%c0, %c0_1, %c0_2] : memref<1x16x48xf32, #tpu.memory_space<vmem>>, vector<1x16x48xf32>
    %4 = vector.shape_cast %3 : vector<1x16x48xf32> to vector<16x48xf32>
    %c0_3 = arith.constant 0 : index
    %c0_4 = arith.constant 0 : index
    %5 = vector.load %arg2[%c0_3, %c0_4] : memref<48x9xf32, #tpu.memory_space<vmem>>, vector<48x9xf32>
    %cst = arith.constant dense<0.000000e+00> : vector<16x9xf32>
    %6 = tpu.matmul %4, %5, %cst {dimension_numbers = #tpu.dot_dimension_numbers<[1], [0], [0], [1], [0, 0, 1, 1], [], []>} : vector<16x48xf32>, vector<48x9xf32>, vector<16x9xf32> -> vector<16x9xf32>
    %c0_5 = arith.constant 0 : index
    %c0_6 = arith.constant 0 : index
    %c0_7 = arith.constant 0 : index
    %7 = vector.load %arg4[%c0_5, %c0_6, %c0_7] : memref<1x16x9xf32, #tpu.memory_space<vmem>>, vector<1x16x9xf32>
    %8 = vector.shape_cast %6 : vector<16x9xf32> to vector<1x16x9xf32>
    %9 = arith.addf %7, %8 : vector<1x16x9xf32>
    %c0_8 = arith.constant 0 : index
    %c0_9 = arith.constant 0 : index
    %c0_10 = arith.constant 0 : index
    %10 = vector.load %arg4[%c0_8, %c0_9, %c0_10] : memref<1x16x9xf32, #tpu.memory_space<vmem>>, vector<1x16x9xf32>
    tpu.vector_store %arg4[%c0_8, %c0_9, %c0_10], %9 {strides = array<i32>} : memref<1x16x9xf32, #tpu.memory_space<vmem>>, vector<1x16x9xf32>,
    return
  }
  func.func @transform_0(%arg0: i32, %arg1: i32) -> (i32, i32) {
    %c0_i32 = arith.constant 0 : i32
    %c0_i32_0 = arith.constant 0 : i32
    return %arg1, %c0_i32 : i32, i32
  }
  func.func @transform_1(%arg0: i32, %arg1: i32) -> (i32, i32, i32) {
    %c0_i32 = arith.constant 0 : i32
    %c0_i32_0 = arith.constant 0 : i32
    return %arg0, %c0_i32, %arg1 : i32, i32, i32
  }
  func.func @transform_2(%arg0: i32, %arg1: i32) -> (i32, i32, i32) {
    %c0_i32 = arith.constant 0 : i32
    %c0_i32_0 = arith.constant 0 : i32
    %c0_i32_1 = arith.constant 0 : i32
    return %arg0, %c0_i32, %c0_i32_0 : i32, i32, i32
  }
}

</mosaic_0001>

<bundles_post_ra>
// kernel: tpu_custom_call.1
= control target key start
LH: loop header
LB: loop body
LE: loop exit
PB: predicated region body
PF: predicated region fallthrough
CT: control target
= control target key end

     0   :  { %s494_s9 = smov 0   ;;  %s496_s10 = smov 0   ;;  %s549_s0 = inlined_call_operand.vmem [shape: f32[48,9], index: 0, kind: input, shape index: {}]   ;;  %s550_s1 = inlined_call_operand.vmem [shape: f32[2,16,48], index: 1, kind: input, shape index: {}]   ;;  %s551_s2 = inlined_call_operand.vmem [shape: f32[2,16,9], index: 2, kind: output, shape index: {}]  }
   0x1   :  { %s498_s11 = smov 0  }
   0x2 LB: > { %s24_s12 = sadd.s32 1, %s472_s10  ;;  %p383_p0 = scmp.ge.s32.totalorder %s476_s11, 1  ;;  %s476_s11 = sphi %s498_s11, %s12_s11   ;;  %s472_s10 = sphi %s496_s10, %s553_s10   ;;  %s468_s9 = sphi %s494_s9, %s552_s9  }
   0x3   : > { %p26_p1 = scmp.ge.s32.totalorder %s24_s12, 2  ;;  %p140_p2 = scmp.lt.s32.totalorder %s476_s11, 3 }
   0x5   : > { %s555_s12 = smov (%p26_p1, %s24_s12), 0  ;;  %p141_p3 = pnand %p383_p0, %p140_p2 }
   0x6   : > { %v198_v0 = vld [vmem:[%s549_s0] sm:$0xff] (!%p141_p3)  ;;  %v199_v1 = vld [vmem:[%s549_s0 + $0x8] sm:$0xff] (!%p141_p3)  ;;  %v200_v2 = vld [vmem:[%s549_s0 + $0x10] sm:$0xff] (!%p141_p3)  ;;  %p176_p4 = scmp.lt.s32.totalorder (!%p141_p3), %s468_s9, 1  ;;  %vm193_vm0 = vcmask (!%p141_p3), 72704   ;;  %vm204_vm1 = vcmask (!%p141_p3), 392192  }
   0x7   : > { %144 = sbr.rel (%p141_p3) target bundleno = 237 (0xed), region = 28  ;;  %v417_v3 = vpack.c.bf16 (!%p141_p3), %v199_v1, %v198_v0  ;;  %v201_v4 = vld [vmem:[%s549_s0 + $0x18] sm:$0xff] (!%p141_p3)  ;;  %v202_v6 = vld [vmem:[%s549_s0 + $0x20] sm:$0xff] (!%p141_p3)  ;;  %v203_v7 = vld [vmem:[%s549_s0 + $0x28] sm:$0xff] (!%p141_p3)  ;;  %v478_v9 = vmov (!%p141_p3), 0.0  }
   0x8   : > { %v421_v5 = vpack.c.bf16 (!%p141_p3), %v201_v4, %v200_v2  ;;  %v425_v8 = vpack.c.bf16 (!%p141_p3), %v203_v7, %v202_v6 }
   0x9   : > { %418 = vmatprep.subr.bf16.mxu0 (!%p141_p3), %v417_v3 }
   0xa   : > { %420 = vmatpush3.bf16.msra.mxu0 (!%p141_p3), %v417_v3 }
   0xb   : > { %422 = vmatprep.subr.bf16.mxu0 (!%p141_p3), %v421_v5 }
   0xe   : > { %s557_s9 = smov (!%p176_p4, %s468_s9), 1  ;;  %424 = vmatpush3.bf16.msra.mxu0 %v421_v5 }
   0xf   : > { %s392_s25 = sshll.u32 %s557_s9, 4  ;;  %426 = vmatprep.subr.bf16.mxu0 %v425_v8 }
  0x10   : > { %s183_s28 = scalar_lea.vmem %s550_s1, %s392_s25  ;;  %s188_s3 = scalar_lea.vmem %s551_s2, %s392_s25 }
  0x11   : > { %194 = vst.msk [vmem:[%s188_s3] sm:$0xff] %vm193_vm0, %v478_v9  ;;  %195 = vst.msk [vmem:[%s188_s3 + $0x8] sm:$0xff] %vm193_vm0, %v478_v9  ;;  %v196_v10 = vld [vmem:[%s183_s28] sm:$0xff]  ;;  %v197_v11 = vld [vmem:[%s183_s28 + $0x8] sm:$0xff] }
  0x12   : > { %414 = vmatprep.mubr.msk.f32.mxu0 %vm204_vm1, %v196_v10  ;;  %428 = vmatpush3.bf16.msra.mxu0 %v425_v8 }
  0x15   : > { %415 = vmatmul.mubr.msk.f32.vlgmr.msra.gmra.mrb[0].mxu0 %vm204_vm1, %v197_v11 }
  0x18   : > { %v287_v12 = vld [vmem:[%s188_s3 + $0x8] sm:$0xff]  ;;  %v286_v13 = vld [vmem:[%s188_s3] sm:$0xff] }
  0xe8   : > { %v416_v14 = vpop.f32.mrb[0].mxu0 }
  0xe9   : > { %v289_v15 = vadd.f32 %v416_v14, %v287_v12  ;;  %v277_v16 = vpop.f32.mrb[1].mxu0 }
  0xea   : > { %v288_v17 = vadd.f32 %v286_v13, %v277_v16 }
  0xeb   : > { %292 = vst.msk [vmem:[%s188_s3 + $0x8] sm:$0xff] %vm193_vm0, %v289_v15 }
  0xec   : > { %291 = vst.msk [vmem:[%s188_s3] sm:$0xff] %vm193_vm0, %v288_v17 }
  0xed PF: > { %s12_s11 = sadd.s32 1, %s476_s11   ;;  %s552_s9 = smov %s472_s10 }
  0xee   : > { %p9_p5 = scmp.ge.s32.totalorder %s12_s11, 4   ;;  %s553_s10 = smov %s555_s12 }
  0xf0   :  { %11 = sbr.rel (!%p9_p5) target bundleno = 2 (0x2), region = 65 }

</bundles_post_ra>
